<compile_context>
chip_gen: v5e
topology: v5e:2x2
jax: 0.10.0
libtpu: 0.0.40
codegen_flags: <defaults>
</compile_context>

<pallas_src>
import jax
import jax.numpy as jnp
from jax.experimental import pallas as pl
from jax.experimental.pallas import tpu as pltpu


def _residual_block_kernel(x_ref, w1_ref, w2_ref, sb_ref, o_ref):
    """One batch element per grid step, everything lane-dense.

    x_ref  : (1, H, W*C)    input rows, channels folded into lanes
    w1_ref : (3, W*C, W*C)  conv1 weights as per-dy Toeplitz matmul matrices
    w2_ref : (3, W*C, W*C)  conv2 weights, same layout
    sb_ref : (4, W*C)       folded BN params [s1, b1, s2, b2] tiled across W
    o_ref  : (1, H, W*C)    output rows
    """
    H = x_ref.shape[1]
    x = x_ref[0].astype(jnp.float32)                         # (H, W*C)

    rows = jax.lax.broadcasted_iota(jnp.int32, (H, 1), 0)
    top = rows == 0
    bot = rows == H - 1

    def conv3x3(a, w_ref):
        # a[h] is the (W*Cin)-flattened input row h.  dy=0/2 taps read rows
        # h-1 / h+1 (zero at the image border); the dx taps and the W-side
        # zero padding are already folded into the Toeplitz weights.
        # pltpu.roll requires shift >= 0, so "shift by -1" is written as a
        # circular shift by H-1, with the wrapped row masked at the border.
        a_up = jnp.where(top, 0.0, pltpu.roll(a, shift=1, axis=0))      # row h-1
        a_dn = jnp.where(bot, 0.0, pltpu.roll(a, shift=H - 1, axis=0))  # row h+1
        acc = jnp.dot(a_up, w_ref[0], preferred_element_type=jnp.float32)
        acc += jnp.dot(a, w_ref[1], preferred_element_type=jnp.float32)
        acc += jnp.dot(a_dn, w_ref[2], preferred_element_type=jnp.float32)
        return acc

    # conv1 -> bn1 -> relu
    y = conv3x3(x, w1_ref)
    y = jnp.maximum(y * sb_ref[0] + sb_ref[1], 0.0)
    # conv2 -> bn2 -> +identity -> relu
    z = conv3x3(y, w2_ref)
    z = z * sb_ref[2] + sb_ref[3]
    o_ref[0] = jnp.maximum(z + x, 0.0).astype(o_ref.dtype)


def _toeplitz_conv_weights(w_oihw, W):
    """(Cout, Cin, 3, 3) -> (3, W*Cin, W*Cout) per-dy Toeplitz matrices.

    m[dy, w_in*Cin + ci, w_out*Cout + co] = w[co, ci, dy, w_in - w_out + 1]
    when 0 <= w_in - w_out + 1 <= 2, else 0 (encodes padding=1 along W).
    Pure weight re-layout, done once in the wrapper.
    """
    Cout, Cin = w_oihw.shape[0], w_oihw.shape[1]
    k = jnp.transpose(w_oihw, (2, 3, 1, 0))                  # (3, 3, Cin, Cout)
    w_in = jnp.arange(W)[:, None]
    w_out = jnp.arange(W)[None, :]
    dx = w_in - w_out + 1                                    # (W, W)
    valid = (dx >= 0) & (dx <= 2)
    m = k[:, jnp.clip(dx, 0, 2)]                             # (3, W, W, Cin, Cout)
    m = m * valid[None, :, :, None, None]
    m = jnp.transpose(m, (0, 1, 3, 2, 4))                    # (3, Win, Cin, Wout, Cout)
    return m.reshape(3, W * Cin, W * Cout)


def residual_block_pallas(x_nchw, w1_oihw, g1, be1, m1, v1,
                          w2_oihw, g2, be2, m2, v2, eps=1e-5):
    """Forward pass of ResidualBlock (stride=1, downsample=None, BN eval mode)."""
    N, Cin, H, W = x_nchw.shape
    Cout = w1_oihw.shape[0]
    assert Cin == Cout, "identity add requires in_channels == out_channels"
    WC = W * Cout

    # layout glue only: NCHW -> (N, H, W*C), channels on the lane axis
    x_rows = jnp.transpose(x_nchw, (0, 2, 3, 1)).reshape(N, H, W * Cin)

    # weights -> per-dy Toeplitz matmul matrices (conv + W padding folded in)
    w1_t = _toeplitz_conv_weights(w1_oihw, W)
    w2_t = _toeplitz_conv_weights(w2_oihw, W)

    # fold BN (eval mode) into per-channel scale/bias, tiled across W, packed
    s1 = g1 / jnp.sqrt(v1 + eps)
    b1 = be1 - m1 * s1
    s2 = g2 / jnp.sqrt(v2 + eps)
    b2 = be2 - m2 * s2
    sb = jnp.stack([jnp.tile(s1, W), jnp.tile(b1, W),
                    jnp.tile(s2, W), jnp.tile(b2, W)], axis=0)   # (4, W*C)

    out_rows = pl.pallas_call(
        _residual_block_kernel,
        out_shape=jax.ShapeDtypeStruct((N, H, WC), x_nchw.dtype),
        grid_spec=pltpu.PrefetchScalarGridSpec(
            num_scalar_prefetch=0,
            grid=(N,),
            in_specs=[
                pl.BlockSpec((1, H, WC), lambda n: (n, 0, 0)),
                pl.BlockSpec((3, WC, WC), lambda n: (0, 0, 0)),
                pl.BlockSpec((3, WC, WC), lambda n: (0, 0, 0)),
                pl.BlockSpec((4, WC), lambda n: (0, 0)),
            ],
            out_specs=pl.BlockSpec((1, H, WC), lambda n: (n, 0, 0)),
        ),
        compiler_params=pltpu.CompilerParams(
            dimension_semantics=("parallel",)),
    )(x_rows, w1_t, w2_t, sb)

    # layout glue: (N, H, W*C) -> NCHW
    return jnp.transpose(out_rows.reshape(N, H, W, Cout), (0, 3, 1, 2))


def _reference(x, w1, g1, be1, m1, v1, w2, g2, be2, m2, v2, eps=1e-5):
    """Pure-JAX reference matching PyTorch (eval-mode BN) semantics. NCHW."""
    def conv(a, w):
        return jax.lax.conv_general_dilated(
            a, w, (1, 1), ((1, 1), (1, 1)),
            dimension_numbers=("NCHW", "OIHW", "NCHW"))

    def bn(a, g, b, m, v):
        sh = (1, -1, 1, 1)
        return (a - m.reshape(sh)) / jnp.sqrt(v.reshape(sh) + eps) \
            * g.reshape(sh) + b.reshape(sh)

    out = jnp.maximum(bn(conv(x, w1), g1, be1, m1, v1), 0.0)
    out = bn(conv(out, w2), g2, be2, m2, v2)
    return jnp.maximum(out + x, 0.0)


if __name__ == "__main__":
    # Small deterministic config: N=2, C_in=C_out=8, H=W=16  (W*C = 128 lanes).
    N, C, H, W = 2, 8, 16, 16
    key = jax.random.PRNGKey(0)
    ks = jax.random.split(key, 12)

    x = jax.random.normal(ks[0], (N, C, H, W), jnp.float32)

    # conv weights (PyTorch OIHW layout), bias=False
    w1 = jax.random.normal(ks[1], (C, C, 3, 3), jnp.float32) * 0.1
    w2 = jax.random.normal(ks[2], (C, C, 3, 3), jnp.float32) * 0.1

    # BatchNorm parameters + running stats (eval-mode), deterministic values
    g1 = 1.0 + 0.1 * jax.random.normal(ks[3], (C,), jnp.float32)
    be1 = 0.1 * jax.random.normal(ks[4], (C,), jnp.float32)
    m1 = 0.1 * jax.random.normal(ks[5], (C,), jnp.float32)
    v1 = 1.0 + 0.1 * jax.nn.softplus(jax.random.normal(ks[6], (C,), jnp.float32))

    g2 = 1.0 + 0.1 * jax.random.normal(ks[7], (C,), jnp.float32)
    be2 = 0.1 * jax.random.normal(ks[8], (C,), jnp.float32)
    m2 = 0.1 * jax.random.normal(ks[9], (C,), jnp.float32)
    v2 = 1.0 + 0.1 * jax.nn.softplus(jax.random.normal(ks[10], (C,), jnp.float32))

    out = residual_block_pallas(x, w1, g1, be1, m1, v1, w2, g2, be2, m2, v2)
    out = jax.block_until_ready(out)

    ref = _reference(x, w1, g1, be1, m1, v1, w2, g2, be2, m2, v2)
    assert out.shape == (N, C, H, W)
    err = jnp.max(jnp.abs(out - ref))
    assert jnp.allclose(out, ref, atol=1e-3, rtol=1e-3), f"max abs err = {err}"

    print("KERNEL_OK")
</pallas_src>

<mosaic_0001>
module attributes {stable_mosaic.version = 11 : i64} {
  func.func @_residual_block_kernel(%arg0: i32, %arg1: memref<1x16x128xf32, #tpu.memory_space<vmem>>, %arg2: memref<3x128x128xf32, #tpu.memory_space<vmem>>, %arg3: memref<3x128x128xf32, #tpu.memory_space<vmem>>, %arg4: memref<4x128xf32, #tpu.memory_space<vmem>>, %arg5: memref<1x16x128xf32, #tpu.memory_space<vmem>>) attributes {dimension_semantics = [#tpu.dimension_semantics<parallel>], iteration_bounds = array<i64: 2>, scalar_prefetch = 0 : i64, scratch_operands = 0 : i64, tpu.core_type = #tpu.core_type<tc>, window_params = [{transform_indices = @transform_0, window_bounds = array<i64: 1, 16, 128>}, {pipeline_mode = #tpu.pipeline_mode<synchronous>, transform_indices = @transform_1, window_bounds = array<i64: 3, 128, 128>}, {pipeline_mode = #tpu.pipeline_mode<synchronous>, transform_indices = @transform_2, window_bounds = array<i64: 3, 128, 128>}, {pipeline_mode = #tpu.pipeline_mode<synchronous>, transform_indices = @transform_3, window_bounds = array<i64: 4, 128>}, {transform_indices = @transform_4, window_bounds = array<i64: 1, 16, 128>}]} {
    %c0 = arith.constant 0 : index
    %c0_0 = arith.constant 0 : index
    %c0_1 = arith.constant 0 : index
    %0 = vector.load %arg1[%c0, %c0_0, %c0_1] : memref<1x16x128xf32, #tpu.memory_space<vmem>>, vector<1x16x128xf32>
    %1 = vector.shape_cast %0 : vector<1x16x128xf32> to vector<16x128xf32>
    %2 = tpu.iota {dimensions = array<i32: 0>} : vector<16x1xi32>
    %c0_i32 = arith.constant 0 : i32
    %3 = vector.broadcast %c0_i32 : i32 to vector<16x1xi32>
    %4 = arith.cmpi eq, %2, %3 : vector<16x1xi32>
    %c15_i32 = arith.constant 15 : i32
    %5 = vector.broadcast %c15_i32 : i32 to vector<16x1xi32>
    %6 = arith.cmpi eq, %2, %5 : vector<16x1xi32>
    %c1_i32 = arith.constant 1 : i32
    %7 = tpu.dynamic_rotate %1 by %c1_i32 dim 0 : vector<16x128xf32>, i32 -> vector<16x128xf32>
    %cst = arith.constant 0.000000e+00 : f32
    %8 = vector.shape_cast %4 : vector<16x1xi1> to vector<16x1xi1>
    %9 = vector.broadcast %8 : vector<16x1xi1> to vector<16x128xi1>
    %10 = vector.broadcast %cst : f32 to vector<16x128xf32>
    %11 = arith.select %9, %10, %7 : vector<16x128xi1>, vector<16x128xf32>
    %c15_i32_2 = arith.constant 15 : i32
    %12 = tpu.dynamic_rotate %1 by %c15_i32_2 dim 0 : vector<16x128xf32>, i32 -> vector<16x128xf32>
    %cst_3 = arith.constant 0.000000e+00 : f32
    %13 = vector.shape_cast %6 : vector<16x1xi1> to vector<16x1xi1>
    %14 = vector.broadcast %13 : vector<16x1xi1> to vector<16x128xi1>
    %15 = vector.broadcast %cst_3 : f32 to vector<16x128xf32>
    %16 = arith.select %14, %15, %12 : vector<16x128xi1>, vector<16x128xf32>
    %c0_4 = arith.constant 0 : index
    %c0_5 = arith.constant 0 : index
    %c0_6 = arith.constant 0 : index
    %17 = vector.load %arg2[%c0_4, %c0_5, %c0_6] : memref<3x128x128xf32, #tpu.memory_space<vmem>>, vector<1x128x128xf32>
    %18 = vector.shape_cast %17 : vector<1x128x128xf32> to vector<128x128xf32>
    %cst_7 = arith.constant dense<0.000000e+00> : vector<16x128xf32>
    %19 = tpu.matmul %11, %18, %cst_7 {dimension_numbers = #tpu.dot_dimension_numbers<[1], [0], [0], [1], [0, 0, 1, 1], [], []>} : vector<16x128xf32>, vector<128x128xf32>, vector<16x128xf32> -> vector<16x128xf32>
    %c1 = arith.constant 1 : index
    %c0_8 = arith.constant 0 : index
    %c0_9 = arith.constant 0 : index
    %20 = vector.load %arg2[%c1, %c0_8, %c0_9] : memref<3x128x128xf32, #tpu.memory_space<vmem>>, vector<1x128x128xf32>
    %21 = vector.shape_cast %20 : vector<1x128x128xf32> to vector<128x128xf32>
    %cst_10 = arith.constant dense<0.000000e+00> : vector<16x128xf32>
    %22 = tpu.matmul %1, %21, %cst_10 {dimension_numbers = #tpu.dot_dimension_numbers<[1], [0], [0], [1], [0, 0, 1, 1], [], []>} : vector<16x128xf32>, vector<128x128xf32>, vector<16x128xf32> -> vector<16x128xf32>
    %23 = arith.addf %19, %22 : vector<16x128xf32>
    %c2 = arith.constant 2 : index
    %c0_11 = arith.constant 0 : index
    %c0_12 = arith.constant 0 : index
    %24 = vector.load %arg2[%c2, %c0_11, %c0_12] : memref<3x128x128xf32, #tpu.memory_space<vmem>>, vector<1x128x128xf32>
    %25 = vector.shape_cast %24 : vector<1x128x128xf32> to vector<128x128xf32>
    %cst_13 = arith.constant dense<0.000000e+00> : vector<16x128xf32>
    %26 = tpu.matmul %16, %25, %cst_13 {dimension_numbers = #tpu.dot_dimension_numbers<[1], [0], [0], [1], [0, 0, 1, 1], [], []>} : vector<16x128xf32>, vector<128x128xf32>, vector<16x128xf32> -> vector<16x128xf32>
    %27 = arith.addf %23, %26 : vector<16x128xf32>
    %c0_14 = arith.constant 0 : index
    %c0_15 = arith.constant 0 : index
    %28 = vector.load %arg4[%c0_14, %c0_15] : memref<4x128xf32, #tpu.memory_space<vmem>>, vector<1x128xf32>
    %29 = vector.shape_cast %28 : vector<1x128xf32> to vector<128xf32>
    %30 = vector.shape_cast %29 : vector<128xf32> to vector<1x128xf32>
    %31 = vector.broadcast %30 : vector<1x128xf32> to vector<16x128xf32>
    %32 = arith.mulf %27, %31 : vector<16x128xf32>
    %c1_16 = arith.constant 1 : index
    %c0_17 = arith.constant 0 : index
    %33 = vector.load %arg4[%c1_16, %c0_17] : memref<4x128xf32, #tpu.memory_space<vmem>>, vector<1x128xf32>
    %34 = vector.shape_cast %33 : vector<1x128xf32> to vector<128xf32>
    %35 = vector.shape_cast %34 : vector<128xf32> to vector<1x128xf32>
    %36 = vector.broadcast %35 : vector<1x128xf32> to vector<16x128xf32>
    %37 = arith.addf %32, %36 : vector<16x128xf32>
    %cst_18 = arith.constant 0.000000e+00 : f32
    %38 = vector.broadcast %cst_18 : f32 to vector<16x128xf32>
    %39 = arith.maximumf %37, %38 : vector<16x128xf32>
    %c1_i32_19 = arith.constant 1 : i32
    %40 = tpu.dynamic_rotate %39 by %c1_i32_19 dim 0 : vector<16x128xf32>, i32 -> vector<16x128xf32>
    %cst_20 = arith.constant 0.000000e+00 : f32
    %41 = vector.shape_cast %4 : vector<16x1xi1> to vector<16x1xi1>
    %42 = vector.broadcast %41 : vector<16x1xi1> to vector<16x128xi1>
    %43 = vector.broadcast %cst_20 : f32 to vector<16x128xf32>
    %44 = arith.select %42, %43, %40 : vector<16x128xi1>, vector<16x128xf32>
    %c15_i32_21 = arith.constant 15 : i32
    %45 = tpu.dynamic_rotate %39 by %c15_i32_21 dim 0 : vector<16x128xf32>, i32 -> vector<16x128xf32>
    %cst_22 = arith.constant 0.000000e+00 : f32
    %46 = vector.shape_cast %6 : vector<16x1xi1> to vector<16x1xi1>
    %47 = vector.broadcast %46 : vector<16x1xi1> to vector<16x128xi1>
    %48 = vector.broadcast %cst_22 : f32 to vector<16x128xf32>
    %49 = arith.select %47, %48, %45 : vector<16x128xi1>, vector<16x128xf32>
    %c0_23 = arith.constant 0 : index
    %c0_24 = arith.constant 0 : index
    %c0_25 = arith.constant 0 : index
    %50 = vector.load %arg3[%c0_23, %c0_24, %c0_25] : memref<3x128x128xf32, #tpu.memory_space<vmem>>, vector<1x128x128xf32>
    %51 = vector.shape_cast %50 : vector<1x128x128xf32> to vector<128x128xf32>
    %cst_26 = arith.constant dense<0.000000e+00> : vector<16x128xf32>
    %52 = tpu.matmul %44, %51, %cst_26 {dimension_numbers = #tpu.dot_dimension_numbers<[1], [0], [0], [1], [0, 0, 1, 1], [], []>} : vector<16x128xf32>, vector<128x128xf32>, vector<16x128xf32> -> vector<16x128xf32>
    %c1_27 = arith.constant 1 : index
    %c0_28 = arith.constant 0 : index
    %c0_29 = arith.constant 0 : index
    %53 = vector.load %arg3[%c1_27, %c0_28, %c0_29] : memref<3x128x128xf32, #tpu.memory_space<vmem>>, vector<1x128x128xf32>
    %54 = vector.shape_cast %53 : vector<1x128x128xf32> to vector<128x128xf32>
    %cst_30 = arith.constant dense<0.000000e+00> : vector<16x128xf32>
    %55 = tpu.matmul %39, %54, %cst_30 {dimension_numbers = #tpu.dot_dimension_numbers<[1], [0], [0], [1], [0, 0, 1, 1], [], []>} : vector<16x128xf32>, vector<128x128xf32>, vector<16x128xf32> -> vector<16x128xf32>
    %56 = arith.addf %52, %55 : vector<16x128xf32>
    %c2_31 = arith.constant 2 : index
    %c0_32 = arith.constant 0 : index
    %c0_33 = arith.constant 0 : index
    %57 = vector.load %arg3[%c2_31, %c0_32, %c0_33] : memref<3x128x128xf32, #tpu.memory_space<vmem>>, vector<1x128x128xf32>
    %58 = vector.shape_cast %57 : vector<1x128x128xf32> to vector<128x128xf32>
    %cst_34 = arith.constant dense<0.000000e+00> : vector<16x128xf32>
    %59 = tpu.matmul %49, %58, %cst_34 {dimension_numbers = #tpu.dot_dimension_numbers<[1], [0], [0], [1], [0, 0, 1, 1], [], []>} : vector<16x128xf32>, vector<128x128xf32>, vector<16x128xf32> -> vector<16x128xf32>
    %60 = arith.addf %56, %59 : vector<16x128xf32>
    %c2_35 = arith.constant 2 : index
    %c0_36 = arith.constant 0 : index
    %61 = vector.load %arg4[%c2_35, %c0_36] : memref<4x128xf32, #tpu.memory_space<vmem>>, vector<1x128xf32>
    %62 = vector.shape_cast %61 : vector<1x128xf32> to vector<128xf32>
    %63 = vector.shape_cast %62 : vector<128xf32> to vector<1x128xf32>
    %64 = vector.broadcast %63 : vector<1x128xf32> to vector<16x128xf32>
    %65 = arith.mulf %60, %64 : vector<16x128xf32>
    %c3 = arith.constant 3 : index
    %c0_37 = arith.constant 0 : index
    %66 = vector.load %arg4[%c3, %c0_37] : memref<4x128xf32, #tpu.memory_space<vmem>>, vector<1x128xf32>
    %67 = vector.shape_cast %66 : vector<1x128xf32> to vector<128xf32>
    %68 = vector.shape_cast %67 : vector<128xf32> to vector<1x128xf32>
    %69 = vector.broadcast %68 : vector<1x128xf32> to vector<16x128xf32>
    %70 = arith.addf %65, %69 : vector<16x128xf32>
    %71 = arith.addf %70, %1 : vector<16x128xf32>
    %cst_38 = arith.constant 0.000000e+00 : f32
    %72 = vector.broadcast %cst_38 : f32 to vector<16x128xf32>
    %73 = arith.maximumf %71, %72 : vector<16x128xf32>
    %c0_39 = arith.constant 0 : index
    %c0_40 = arith.constant 0 : index
    %c0_41 = arith.constant 0 : index
    %74 = vector.load %arg5[%c0_39, %c0_40, %c0_41] : memref<1x16x128xf32, #tpu.memory_space<vmem>>, vector<1x16x128xf32>
    %75 = vector.shape_cast %74 : vector<1x16x128xf32> to vector<16x128xf32>
    %76 = vector.shape_cast %73 : vector<16x128xf32> to vector<1x16x128xf32>
    tpu.vector_store %arg5[%c0_39, %c0_40, %c0_41], %76 {strides = array<i32>} : memref<1x16x128xf32, #tpu.memory_space<vmem>>, vector<1x16x128xf32>,
    return
  }
  func.func @transform_0(%arg0: i32) -> (i32, i32, i32) {
    %c0_i32 = arith.constant 0 : i32
    %c0_i32_0 = arith.constant 0 : i32
    %c0_i32_1 = arith.constant 0 : i32
    return %arg0, %c0_i32, %c0_i32_0 : i32, i32, i32
  }
  func.func @transform_1(%arg0: i32) -> (i32, i32, i32) {
    %c0_i32 = arith.constant 0 : i32
    %c0_i32_0 = arith.constant 0 : i32
    %c0_i32_1 = arith.constant 0 : i32
    %c0_i32_2 = arith.constant 0 : i32
    return %c0_i32, %c0_i32_0, %c0_i32_1 : i32, i32, i32
  }
  func.func @transform_2(%arg0: i32) -> (i32, i32, i32) {
    %c0_i32 = arith.constant 0 : i32
    %c0_i32_0 = arith.constant 0 : i32
    %c0_i32_1 = arith.constant 0 : i32
    %c0_i32_2 = arith.constant 0 : i32
    return %c0_i32, %c0_i32_0, %c0_i32_1 : i32, i32, i32
  }
  func.func @transform_3(%arg0: i32) -> (i32, i32) {
    %c0_i32 = arith.constant 0 : i32
    %c0_i32_0 = arith.constant 0 : i32
    %c0_i32_1 = arith.constant 0 : i32
    return %c0_i32, %c0_i32_0 : i32, i32
  }
  func.func @transform_4(%arg0: i32) -> (i32, i32, i32) {
    %c0_i32 = arith.constant 0 : i32
    %c0_i32_0 = arith.constant 0 : i32
    %c0_i32_1 = arith.constant 0 : i32
    return %arg0, %c0_i32, %c0_i32_0 : i32, i32, i32
  }
}

</mosaic_0001>

<bundles_post_ra>
// kernel: tpu_custom_call.1
= control target key start
LH: loop header
LB: loop body
LE: loop exit
PB: predicated region body
PF: predicated region fallthrough
CT: control target
= control target key end

     0   :  { %9 = vsyncpa [#allocation3], 0  ;;  %s1290_s0 = inlined_call_operand.hbm [shape: f32[2,16,128], index: 0, kind: input, shape index: {}]   ;;  %s1291_s1 = inlined_call_operand.hbm [shape: f32[3,128,128], index: 1, kind: input, shape index: {}]   ;;  %s1292_s2 = inlined_call_operand.hbm [shape: f32[3,128,128], index: 2, kind: input, shape index: {}]   ;;  %s1293_s3 = inlined_call_operand.hbm [shape: f32[4,128], index: 3, kind: input, shape index: {}]   ;;  %s1294_s4 = inlined_call_operand.hbm [shape: f32[2,16,128], index: 4, kind: output, shape index: {}]  }
   0x1   :  { %11 = vsyncpa [#allocation3 + $0x1], 0 }
   0x2   :  { %12 = vsyncpa [#allocation6], 0 }
   0x3   :  { %13 = vsyncpa [#allocation9], 0 }
   0x4   :  { %14 = vsyncpa [#allocation4], 0 }
   0x5   :  { %16 = vsyncpa [#allocation4 + $0x1], 0  ;;  %s1070_s15 = smov 0   ;;  %s1072_s16 = smov 0  }
   0x6   :  { %s1074_s17 = smov 0   ;;  %s1076_s18 = smov 0  }
   0x7 LB: > { %s1091_s19 = sadd.s32 4294967295, %s1036_s18   ;;  %s693_s20 = sadd.s32 4294967294, %s1036_s18   ;;  %s1036_s18 = sphi %s1076_s18, %s1305_s18   ;;  %s1032_s17 = sphi %s1074_s17, %s1304_s17   ;;  %s1028_s16 = sphi %s1072_s16, %s1303_s16   ;;  %s1024_s15 = sphi %s1070_s15, %s1302_s15  }
   0x8   : > { %p42_p0 = scmp.ne.s32.totalorder %s1028_s16, %s1024_s15  ;;  %p43_p1 = scmp.eq.s32.totalorder %s1091_s19, 0 }
   0x9   : > { %p129_p2 = scmp.eq.s32.totalorder %s1091_s19, 1  ;;  %p135_p3 = scmp.eq.s32.totalorder %s693_s20, 1 }
   0xa   : > { %p1100_p4 = por %p43_p1, %p42_p0  ;;  %p694_p5 = scmp.ge.s32.totalorder %s1036_s18, 1 }
   0xb   : > { %p1105_p6 = por %p135_p3, %p42_p0  ;;  %p142_p7 = scmp.lt.s32.totalorder %s1036_s18, 3 }
   0xc   : > { %s153_s25 = sshll.u32 %s1291_s1, 4  ;;  %s1038_s27 = smov [#allocation5]   ;;  %s154_s25 = int_to_ptr.hbm [resolvable:$true] %s153_s25 }
   0xd   : > { %p1113_p8 = pnand %p694_p5, %p142_p7  ;;  %s155_s28 = sshll.u32 %s1038_s27, 4  ;;  %s156_s28 = int_to_ptr.vmem [resolvable:$true] %s155_s28 }
   0xe   : > { %s167_s6 = sshll.u32 %s1292_s2, 4  ;;  %s1039_s7 = smov 128   ;;  %s168_s6 = int_to_ptr.hbm [resolvable:$true] %s167_s6 }
   0xf   : > { %p773_p9 = pneg %p1113_p8  ;;  %s1040_s8 = smov 8  }
  0x10   : > { %s1041_s9 = smov [#allocation7]   ;;  %s182_s13 = sshll.u32 %s1293_s3, 4  ;;  %s183_s13 = int_to_ptr.hbm [resolvable:$true] %s182_s13 }
  0x11   : > { %p1121_p10 = pnand %p773_p9, %p43_p1  ;;  %s169_s10 = sshll.u32 %s1041_s9, 4  ;;  %s170_s10 = int_to_ptr.vmem [resolvable:$true] %s169_s10 }
  0x12   : > { %s1042_s14 = smov [#allocation8]   ;;  %s1143_s23 = sadd.s32 1, %s1036_s18  }
  0x13   : > { %776 = dma.hbm_to_vmem [thread:$0]  (!%p1121_p10), %s154_s25, 6144, %s156_s28, [#allocation6], %s1039_s7, %s1039_s7, %s1040_s8  }
  0x14   : > { %779 = dma.hbm_to_vmem [thread:$0]  (!%p1121_p10), %s168_s6, 6144, %s170_s10, [#allocation6], %s1039_s7, %s1039_s7, %s1040_s8  }
  0x15   : > { %s184_s20 = sshll.u32 %s1042_s14, 4  ;;  %s26_s24 = ssub.s32 %s1036_s18, %s1143_s23  ;;  %s185_s20 = int_to_ptr.vmem [resolvable:$true] %s184_s20 }
  0x16   : > { %782 = dma.hbm_to_vmem [thread:$0]  (!%p1121_p10), %s183_s13, 64, %s185_s20, [#allocation9]  }
  0x17   : > { %s29_s25 = sadd.s32 1, %s1032_s17  ;;  %p27_p12 = scmp.eq.s32.totalorder %s26_s24, 0 }
  0x18   : > { %p36_p13 = scmp.ne.s32.totalorder %s1032_s17, %s1028_s16  ;;  %p37_p0 = scmp.eq.s32.totalorder %s1036_s18, 0 }
  0x19   : > { %s1154_s27 = scalar_select %p27_p12, %s1032_s17, %s29_s25  }
  0x1a   : > { %p1158_p3 = por %p129_p2, %p36_p13  ;;  %p794_p5 = scmp.lt.s32.totalorder %s1036_s18, 2 }
  0x1b   : > { %s195_s30 = sand.u32 1, %s1032_s17   ;;  %s721_s5 = sshll.u32 %s1036_s18, 4 }
  0x1c   : > { %p38_p7 = por %p37_p0, %p36_p13  ;;  %s699_s6 = sshll.u32 %s195_s30, 4 }
  0x1d   : > { %s204_s10 = scalar_lea.hbm %s1290_s0, %s721_s5  ;;  %s199_s12 = scalar_lea.vmem [#allocation2], %s699_s6 }
  0x1e   : > { %s205_s11 = sshll.u32 %s204_s10, 4  ;;  %s207_s13 = sshll.u32 %s199_s12, 4  ;;  %s206_s11 = int_to_ptr.hbm [resolvable:$true] %s205_s11  ;;  %s208_s13 = int_to_ptr.vmem [resolvable:$true] %s207_s13 }
  0x1f   : > { %p1168_p9 = pnand %p794_p5, %p38_p7  ;;  %s196_s20 = scalar_lea.sflag [#allocation3], %s195_s30 }
  0x20   : > { %s932_s24 = sshra.s32 %s206_s11, 4  ;;  %s939_s6 = scalar_lea.hbm %s1290_s0, 32  ;;  %s933_s24 = int_to_ptr.hbm [resolvable:$true] %s932_s24 }
  0x21   : > { %s934_s25 = scalar_lea.hbm %s933_s24, 16  ;;  %p936_p10 = pneg %p1168_p9 }
  0x22   : > { %p935_p2 = scmp.ne.s32.totalorder %s933_s24, %s934_s25  ;;  %p940_p0 = scmp.lt.s32.totalorder %s933_s24, %s1290_s0 }
  0x23   : > { %p941_p5 = scmp.lt.s32.totalorder %s939_s6, %s934_s25 }
  0x24   : > { %p937_p12 = pnand %p936_p10, %p935_p2 }
  0x25   : > { %p942_p7 = por %p941_p5, %p940_p0 }
  0x26   : > { %p938_p13 = pneg %p937_p12 }
  0x28   : > { %p943_p11 = pnand %p942_p7, %p938_p13 }
  0x2a   : > { %946 = shalt.err (!%p943_p11)
}
  0x2b   : > { %786 = dma.hbm_to_vmem [thread:$0]  (!%p1168_p9), %s206_s11, 256, %s208_s13, %s196_s20, %s1039_s7, %s1039_s7, %s1040_s8  }
  0x2c   : > { %219 = sbr.rel (%p1113_p8) target bundleno = 388 (0x184), region = 36  ;;  %s1188_s30 = sand.u32 (!%p1113_p8), 1, %s1028_s16  }
  0x2d   : > { %s703_s12 = sshll.u32 (!%p1113_p8), %s1188_s30, 4  ;;  %s222_s24 = scalar_lea.sflag (!%p1113_p8), [#allocation3], %s1188_s30 }
  0x2e   : > { %s1194_s25 = scalar_lea.vmem (!%p1113_p8), [#allocation2], %s703_s12 }
  0x31   : > { %1007 = dma.done.wait (%p1100_p4), %s222_s24, 256  }
  0x32   : > { %1009 = vsyncadd (%p1100_p4), %s222_s24, 4294967040 }
  0x33   : > { %1011 = dma.done.wait (%p43_p1), [#allocation6], 12288  }
  0x34   : > { %1013 = vsyncadd (%p43_p1), [#allocation6], 4294955008 }
  0x35   : > { %1015 = dma.done.wait (%p43_p1), [#allocation9], 64  }
  0x36   : > { %1017 = vsyncadd (%p43_p1), [#allocation9], 4294967232  ;;  %v392_v0 = vld [vmem:[#allocation5 + $0x178] sm:$0xff]  ;;  %v391_v1 = vld [vmem:[#allocation5 + $0x170] sm:$0xff]  ;;  %v268_v29 = vlaneseq  ;;  %s722_s21 = sshll.u32 %s1091_s19, 4  ;;  %s265_s26 = scalar_lea.vmem [#allocation10], %s703_s12 }
  0x37   : > { %v329_v2 = vld [vmem:[#allocation5 + $0xf8] sm:$0xff]  ;;  %393 = vmatpush.msra.mxu2 %v392_v0  ;;  %v328_v4 = vld [vmem:[#allocation5 + $0xf0] sm:$0xff]  ;;  %v390_v5 = vld [vmem:[#allocation5 + $0x168] sm:$0xff]  ;;  %s587_s11 = scalar_lea.hbm %s1294_s4, %s722_s21  ;;  %s588_s13 = sshll.u32 %s265_s26, 4  ;;  %s589_s13 = int_to_ptr.vmem [resolvable:$true] %s588_s13 }
  0x38   : > { %330 = vmatpush.msra.mxu0 %v329_v2  ;;  %v312_v3 = vld [vmem:[#allocation5 + $0x78] sm:$0xff]  ;;  %v311_v6 = vld [vmem:[#allocation5 + $0x70] sm:$0xff]  ;;  %v327_v7 = vld [vmem:[#allocation5 + $0xe8] sm:$0xff]  ;;  %v1208_v38 = vshrl.u32 %v268_v29, 7  ;;  %s590_s14 = sshll.u32 %s587_s11, 4  ;;  %s576_s19 = scalar_lea.sflag [#allocation4], %s1188_s30  ;;  %s591_s14 = int_to_ptr.hbm [resolvable:$true] %s590_s14 }
  0x39   : > { %353 = vmatpush.msra.mxu1 %v312_v3  ;;  %394 = vmatpush.msra.mxu2 %v391_v1  ;;  %v310_v8 = vld [vmem:[#allocation5 + $0x68] sm:$0xff]  ;;  %v389_v9 = vld [vmem:[#allocation5 + $0x160] sm:$0xff]  ;;  %v388_v12 = vld [vmem:[#allocation5 + $0x158] sm:$0xff]  ;;  %s976_s20 = sshra.s32 %s591_s14, 4  ;;  %s982_s9 = scalar_lea.hbm %s1294_s4, 32  ;;  %s977_s20 = int_to_ptr.hbm [resolvable:$true] %s976_s20 }
  0x3a   : > { %331 = vmatpush.msra.mxu0 %v328_v4  ;;  %v326_v10 = vld [vmem:[#allocation5 + $0xe0] sm:$0xff]  ;;  %v325_v13 = vld [vmem:[#allocation5 + $0xd8] sm:$0xff]  ;;  %v387_v15 = vld [vmem:[#allocation5 + $0x150] sm:$0xff]  ;;  %vm288_vm0 = vcmp.lt.s32.totalorder %v1208_v38, 7  ;;  %vm277_vm1 = vcmp.lt.s32.totalorder %v1208_v38, 1  ;;  %vm723_vm2 = vcmp.ne.s32.totalorder %v1208_v38, 0  ;;  %p983_p11 = scmp.lt.s32.totalorder %s977_s20, %s1294_s4 }
  0x3b   : > { %354 = vmatpush.msra.mxu1 %v311_v6  ;;  %395 = vmatpush.msra.mxu2 %v390_v5  ;;  %v309_v11 = vld [vmem:[#allocation5 + $0x60] sm:$0xff]  ;;  %v308_v14 = vld [vmem:[#allocation5 + $0x58] sm:$0xff]  ;;  %v324_v16 = vld [vmem:[#allocation5 + $0xd0] sm:$0xff]  ;;  %v1231_v3 = vadd.s32 8, %v1208_v38  ;;  %s978_s5 = scalar_lea.hbm %s977_s20, 16 }
  0x3c   : > { %332 = vmatpush.msra.mxu0 %v327_v7  ;;  %v307_v17 = vld [vmem:[#allocation5 + $0x50] sm:$0xff]  ;;  %v386_v18 = vld [vmem:[#allocation5 + $0x148] sm:$0xff]  ;;  %v385_v21 = vld [vmem:[#allocation5 + $0x140] sm:$0xff]  ;;  %p979_p1 = scmp.ne.s32.totalorder %s977_s20, %s978_s5  ;;  %p984_p9 = scmp.lt.s32.totalorder %s982_s9, %s978_s5 }
  0x3d   : > { %355 = vmatpush.msra.mxu1 %v310_v8  ;;  %396 = vmatpush.msra.mxu2 %v389_v9  ;;  %v323_v19 = vld [vmem:[#allocation5 + $0xc8] sm:$0xff]  ;;  %v322_v22 = vld [vmem:[#allocation5 + $0xc0] sm:$0xff]  ;;  %v384_v24 = vld [vmem:[#allocation5 + $0x138] sm:$0xff]  ;;  %vm724_vm3 = vcmp.ne.s32.totalorder %v1231_v3, 15 }
  0x3e   : > { %333 = vmatpush.msra.mxu0 %v326_v10  ;;  %v306_v20 = vld [vmem:[#allocation5 + $0x48] sm:$0xff]  ;;  %v305_v23 = vld [vmem:[#allocation5 + $0x40] sm:$0xff]  ;;  %v321_v25 = vld [vmem:[#allocation5 + $0xb8] sm:$0xff]  ;;  %p980_p4 = pnand %p979_p1, %p1158_p3  ;;  %p985_p2 = por %p984_p9, %p983_p11 }
  0x3f   : > { %356 = vmatpush.msra.mxu1 %v309_v11  ;;  %397 = vmatpush.msra.mxu2 %v388_v12  ;;  %v304_v26 = vld [vmem:[#allocation5 + $0x38] sm:$0xff]  ;;  %v383_v27 = vld [vmem:[#allocation5 + $0x130] sm:$0xff]  ;;  %v382_v32 = vld [vmem:[#allocation5 + $0x128] sm:$0xff] }
  0x40   : > { %334 = vmatpush.msra.mxu0 %v325_v13  ;;  %v320_v28 = vld [vmem:[#allocation5 + $0xb0] sm:$0xff]  ;;  %v472_v31 = vld [vmem:[#allocation7 + $0xf8] sm:$0xff]  ;;  %v319_v33 = vld [vmem:[#allocation5 + $0xa8] sm:$0xff]  ;;  %p981_p8 = pneg %p980_p4 }
  0x41   : > { %357 = vmatpush.msra.mxu1 %v308_v14  ;;  %398 = vmatpush.msra.mxu2 %v387_v15  ;;  %v303_v30 = vld [vmem:[#allocation5 + $0x30] sm:$0xff]  ;;  %v302_v34 = vld [vmem:[#allocation5 + $0x28] sm:$0xff]  ;;  %v381_v36 = vld [vmem:[#allocation5 + $0x120] sm:$0xff] }
  0x42   : > { %335 = vmatpush.msra.mxu0 %v324_v16  ;;  %v471_v35 = vld [vmem:[#allocation7 + $0xf0] sm:$0xff]  ;;  %v318_v37 = vld [vmem:[#allocation5 + $0xa0] sm:$0xff]  ;;  %473 = vmatpush.msra.mxu3 %v472_v31  ;;  %v470_v41 = vld [vmem:[#allocation7 + $0xe8] sm:$0xff]  ;;  %p986_p10 = pnand %p985_p2, %p981_p8 }
  0x43   : > { %358 = vmatpush.msra.mxu1 %v307_v17  ;;  %399 = vmatpush.msra.mxu2 %v386_v18  ;;  %v301_v39 = vld [vmem:[#allocation5 + $0x20] sm:$0xff]  ;;  %v380_v42 = vld [vmem:[#allocation5 + $0x118] sm:$0xff]  ;;  %v379_v45 = vld [vmem:[#allocation5 + $0x110] sm:$0xff] }
  0x44   : > { %336 = vmatpush.msra.mxu0 %v323_v19  ;;  %v1211_v40 = vld [vmem:[%s1194_s25] sm:$0xff]  ;;  %v317_v43 = vld [vmem:[#allocation5 + $0x98] sm:$0xff]  ;;  %474 = vmatpush.msra.mxu3 %v471_v35  ;;  %v378_v48 = vld [vmem:[#allocation5 + $0x108] sm:$0xff] }
  0x45   : > { %359 = vmatpush.msra.mxu1 %v306_v20  ;;  %400 = vmatpush.msra.mxu2 %v385_v21  ;;  %v1214_v44 = vld [vmem:[%s1194_s25 + $0x8] sm:$0xff]  ;;  %v469_v47 = vld [vmem:[#allocation7 + $0xe0] sm:$0xff]  ;;  %v316_v49 = vld [vmem:[#allocation5 + $0x90] sm:$0xff]  ;;  %v286_v51 = vrot.slane %v1211_v40, 1  ;;  %v275_v55 = vrot.slane %v1211_v40, 7 }
  0x46   : > { %337 = vmatpush.msra.mxu0 %v322_v22  ;;  %v300_v46 = vld [vmem:[#allocation5 + $0x18] sm:$0xff]  ;;  %v299_v50 = vld [vmem:[#allocation5 + $0x10] sm:$0xff]  ;;  %v315_v52 = vld [vmem:[#allocation5 + $0x88] sm:$0xff]  ;;  %475 = vmatpush.msra.mxu3 %v470_v41  ;;  %v287_v53 = vrot.slane %v1214_v44, 1  ;;  %v276_v56 = vrot.slane %v1214_v44, 7 }
  0x47   : > { %360 = vmatpush.msra.mxu1 %v305_v23  ;;  %401 = vmatpush.msra.mxu2 %v384_v24  ;;  %v468_v54 = vld [vmem:[#allocation7 + $0xd8] sm:$0xff]  ;;  %v298_v57 = vld [vmem:[#allocation5 + $0x8] sm:$0xff]  ;;  %v467_v58 = vld [vmem:[#allocation7 + $0xd0] sm:$0xff] }
  0x48   : > { %338 = vmatpush.msra.mxu0 %v321_v25  ;;  %476 = vmatpush.msra.mxu3 %v469_v47  ;;  %v377_v59 = vld [vmem:[#allocation5 + $0x100] sm:$0xff]  ;;  %v289_v61 = vsel %vm288_vm0, %v286_v51, %v287_v53  ;;  %v279_v63 = vsel %vm277_vm1, %v276_v56, %v275_v55  ;;  %v466_v0 = vld [vmem:[#allocation7 + $0xc8] sm:$0xff]  ;;  %v455_v1 = vld [vmem:[#allocation7 + $0x78] sm:$0xff]  ;;  %v290_v10 = vsel %vm288_vm0, %v287_v53, %v286_v51 }
  0x49   : > { %361 = vmatpush.msra.mxu1 %v304_v26  ;;  %402 = vmatpush.msra.mxu2 %v383_v27  ;;  %v314_v60 = vld [vmem:[#allocation5 + $0x80] sm:$0xff]  ;;  %v535_v2 = vld [vmem:[#allocation7 + $0x178] sm:$0xff]  ;;  %v454_v5 = vld [vmem:[#allocation7 + $0x70] sm:$0xff]  ;;  %v278_v12 = vsel %vm277_vm1, %v275_v55, %v276_v56 }
  0x4a   : > { %339 = vmatpush.msra.mxu0 %v320_v28  ;;  %477 = vmatpush.msra.mxu3 %v468_v54  ;;  %v297_v62 = vld [vmem:[#allocation5] sm:$0xff]  ;;  %v534_v6 = vld [vmem:[#allocation7 + $0x170] sm:$0xff]  ;;  %v464_v7 = vld [vmem:[#allocation7 + $0xb8] sm:$0xff] }
  0x4b   : > { %362 = vmatpush.msra.mxu1 %v303_v30  ;;  %403 = vmatpush.msra.mxu2 %v382_v32  ;;  %v465_v4 = vld [vmem:[#allocation7 + $0xc0] sm:$0xff]  ;;  %v453_v8 = vld [vmem:[#allocation7 + $0x68] sm:$0xff]  ;;  %v463_v11 = vld [vmem:[#allocation7 + $0xb0] sm:$0xff] }
  0x4c   : > { %340 = vmatpush.msra.mxu0 %v319_v33  ;;  %478 = vmatpush.msra.mxu3 %v467_v58  ;;  %v533_v9 = vld [vmem:[#allocation7 + $0x168] sm:$0xff]  ;;  %v452_v14 = vld [vmem:[#allocation7 + $0x60] sm:$0xff]  ;;  %v451_v17 = vld [vmem:[#allocation7 + $0x58] sm:$0xff] }
  0x4d   : > { %363 = vmatpush.msra.mxu1 %v302_v34  ;;  %404 = vmatpush.msra.mxu2 %v381_v36  ;;  %v462_v13 = vld [vmem:[#allocation7 + $0xa8] sm:$0xff]  ;;  %v532_v15 = vld [vmem:[#allocation7 + $0x160] sm:$0xff]  ;;  %v531_v18 = vld [vmem:[#allocation7 + $0x158] sm:$0xff] }
  0x4e   : > { %341 = vmatpush.msra.mxu0 %v318_v37  ;;  %479 = vmatpush.msra.mxu3 %v466_v0  ;;  %v461_v16 = vld [vmem:[#allocation7 + $0xa0] sm:$0xff]  ;;  %v460_v19 = vld [vmem:[#allocation7 + $0x98] sm:$0xff]  ;;  %v459_v20 = vld [vmem:[#allocation7 + $0x90] sm:$0xff] }
  0x4f   : > { %364 = vmatpush.msra.mxu1 %v301_v39  ;;  %405 = vmatpush.msra.mxu2 %v380_v42  ;;  %v458_v21 = vld [vmem:[#allocation7 + $0x88] sm:$0xff]  ;;  %v457_v22 = vld [vmem:[#allocation7 + $0x80] sm:$0xff]  ;;  %v450_v23 = vld [vmem:[#allocation7 + $0x50] sm:$0xff] }
  0x50   : > { %342 = vmatpush.msra.mxu0 %v317_v43  ;;  %480 = vmatpush.msra.mxu3 %v465_v4  ;;  %v530_v24 = vld [vmem:[#allocation7 + $0x150] sm:$0xff]  ;;  %v449_v25 = vld [vmem:[#allocation7 + $0x48] sm:$0xff]  ;;  %v448_v27 = vld [vmem:[#allocation7 + $0x40] sm:$0xff] }
  0x51   : > { %365 = vmatpush.msra.mxu1 %v300_v46  ;;  %406 = vmatpush.msra.mxu2 %v379_v45  ;;  %v529_v26 = vld [vmem:[#allocation7 + $0x148] sm:$0xff]  ;;  %v528_v28 = vld [vmem:[#allocation7 + $0x140] sm:$0xff]  ;;  %v447_v29 = vld [vmem:[#allocation7 + $0x38] sm:$0xff] }
  0x52   : > { %343 = vmatpush.msra.mxu0 %v316_v49  ;;  %481 = vmatpush.msra.mxu3 %v464_v7  ;;  %v527_v30 = vld [vmem:[#allocation7 + $0x138] sm:$0xff]  ;;  %v446_v31 = vld [vmem:[#allocation7 + $0x30] sm:$0xff]  ;;  %v445_v33 = vld [vmem:[#allocation7 + $0x28] sm:$0xff] }
  0x53   : > { %366 = vmatpush.msra.mxu1 %v299_v50  ;;  %407 = vmatpush.msra.mxu2 %v378_v48  ;;  %v526_v32 = vld [vmem:[#allocation7 + $0x130] sm:$0xff]  ;;  %v525_v34 = vld [vmem:[#allocation7 + $0x128] sm:$0xff]  ;;  %v444_v35 = vld [vmem:[#allocation7 + $0x20] sm:$0xff] }
  0x54   : > { %344 = vmatpush.msra.mxu0 %v315_v52  ;;  %482 = vmatpush.msra.mxu3 %v463_v11  ;;  %v524_v36 = vld [vmem:[#allocation7 + $0x120] sm:$0xff]  ;;  %v443_v37 = vld [vmem:[#allocation7 + $0x18] sm:$0xff]  ;;  %v442_v41 = vld [vmem:[#allocation7 + $0x10] sm:$0xff] }
  0x55   : > { %367 = vmatpush.msra.mxu1 %v298_v57  ;;  %408 = vmatpush.msra.mxu2 %v377_v59  ;;  %v523_v39 = vld [vmem:[#allocation7 + $0x118] sm:$0xff]  ;;  %v522_v42 = vld [vmem:[#allocation7 + $0x110] sm:$0xff]  ;;  %v441_v43 = vld [vmem:[#allocation7 + $0x8] sm:$0xff] }
  0x56   : > { %345 = vmatpush.msra.mxu0 %v314_v60  ;;  %409 = vmatmul.f32.vlgmr.msra.gmra.mxu2 %v289_v61  ;;  %v521_v45 = vld [vmem:[#allocation7 + $0x108] sm:$0xff]  ;;  %v440_v46 = vld [vmem:[#allocation7] sm:$0xff] }
  0x57   : > { %368 = vmatpush.msra.mxu1 %v297_v62  ;;  %346 = vmatmul.f32.vlgmr.msra.gmra.mxu0 %v1211_v40  ;;  %v520_v47 = vld [vmem:[#allocation7 + $0x100] sm:$0xff] }
  0x58   : > { %709 = vmatmul.msk.f32.vlgmr.msra.gmra.mxu1 %vm723_vm2, %v279_v63  ;;  %496 = vmatpush.msrb.mxu0 %v455_v1  ;;  %v838_v51 = vld [vmem:[#allocation8] ss:$0 sm:$0xff]  ;;  %v839_v54 = vld [vmem:[#allocation8 + $0x1] ss:$0 sm:$0xff] }
  0x59   : > { %725 = vmatpush.msrb.mxu2 %v455_v1  ;;  %536 = vmatpush.msrb.mxu1 %v535_v2 }
  0x5a   : > { %497 = vmatpush.msrb.mxu0 %v454_v5  ;;  %483 = vmatpush.msra.mxu3 %v462_v13 }
  0x5b   : > { %726 = vmatpush.msrb.mxu2 %v454_v5  ;;  %537 = vmatpush.msrb.mxu1 %v534_v6 }
  0x5c   : > { %498 = vmatpush.msrb.mxu0 %v453_v8  ;;  %484 = vmatpush.msra.mxu3 %v461_v16 }
  0x5d   : > { %727 = vmatpush.msrb.mxu2 %v453_v8  ;;  %538 = vmatpush.msrb.mxu1 %v533_v9 }
  0x5e   : > { %711 = vmatmul.msk.f32.gmra.mxu2 %vm724_vm3, %v290_v10  ;;  %499 = vmatpush.msrb.mxu0 %v452_v14 }
  0x5f   : > { %349 = vmatmul.f32.gmra.mxu0 %v1214_v44  ;;  %728 = vmatpush.msrb.mxu2 %v452_v14  ;;  %v840_v14 = vld [vmem:[#allocation8 + $0x2] ss:$0 sm:$0xff] }
  0x60   : > { %372 = vmatmul.f32.gmra.mxu1 %v278_v12  ;;  %500 = vmatpush.msrb.mxu0 %v451_v17 }
  0x61   : > { %539 = vmatpush.msrb.mxu1 %v532_v15  ;;  %729 = vmatpush.msrb.mxu2 %v451_v17  ;;  %v841_v17 = vld [vmem:[#allocation8 + $0x3] ss:$0 sm:$0xff] }
  0x62   : > { %485 = vmatpush.msra.mxu3 %v460_v19  ;;  %501 = vmatpush.msrb.mxu0 %v450_v23 }
  0x63   : > { %540 = vmatpush.msrb.mxu1 %v531_v18  ;;  %730 = vmatpush.msrb.mxu2 %v450_v23 }
  0x64   : > { %486 = vmatpush.msra.mxu3 %v459_v20  ;;  %502 = vmatpush.msrb.mxu0 %v449_v25 }
  0x65   : > { %541 = vmatpush.msrb.mxu1 %v530_v24  ;;  %731 = vmatpush.msrb.mxu2 %v449_v25 }
  0x66   : > { %487 = vmatpush.msra.mxu3 %v458_v21  ;;  %503 = vmatpush.msrb.mxu0 %v448_v27 }
  0x67   : > { %542 = vmatpush.msrb.mxu1 %v529_v26  ;;  %732 = vmatpush.msrb.mxu2 %v448_v27 }
  0x68   : > { %488 = vmatpush.msra.mxu3 %v457_v22  ;;  %504 = vmatpush.msrb.mxu0 %v447_v29 }
  0x69   : > { %543 = vmatpush.msrb.mxu1 %v528_v28  ;;  %733 = vmatpush.msrb.mxu2 %v447_v29 }
  0x6a   : > { %741 = vmatpush.msrb.mxu3 %v535_v2  ;;  %505 = vmatpush.msrb.mxu0 %v446_v31 }
  0x6b   : > { %544 = vmatpush.msrb.mxu1 %v527_v30  ;;  %734 = vmatpush.msrb.mxu2 %v446_v31 }
  0x6c   : > { %742 = vmatpush.msrb.mxu3 %v534_v6  ;;  %506 = vmatpush.msrb.mxu0 %v445_v33 }
  0x6d   : > { %545 = vmatpush.msrb.mxu1 %v526_v32  ;;  %735 = vmatpush.msrb.mxu2 %v445_v33 }
  0x6e   : > { %743 = vmatpush.msrb.mxu3 %v533_v9  ;;  %507 = vmatpush.msrb.mxu0 %v444_v35 }
  0x6f   : > { %546 = vmatpush.msrb.mxu1 %v525_v34  ;;  %736 = vmatpush.msrb.mxu2 %v444_v35 }
  0x70   : > { %744 = vmatpush.msrb.mxu3 %v532_v15  ;;  %508 = vmatpush.msrb.mxu0 %v443_v37 }
  0x71   : > { %547 = vmatpush.msrb.mxu1 %v524_v36  ;;  %737 = vmatpush.msrb.mxu2 %v443_v37 }
  0x72   : > { %745 = vmatpush.msrb.mxu3 %v531_v18  ;;  %509 = vmatpush.msrb.mxu0 %v442_v41 }
  0x73   : > { %548 = vmatpush.msrb.mxu1 %v523_v39  ;;  %738 = vmatpush.msrb.mxu2 %v442_v41 }
  0x74   : > { %746 = vmatpush.msrb.mxu3 %v530_v24  ;;  %510 = vmatpush.msrb.mxu0 %v441_v43 }
  0x75   : > { %549 = vmatpush.msrb.mxu1 %v522_v42  ;;  %739 = vmatpush.msrb.mxu2 %v441_v43 }
  0x76   : > { %747 = vmatpush.msrb.mxu3 %v529_v26  ;;  %511 = vmatpush.msrb.mxu0 %v440_v46 }
  0x77   : > { %550 = vmatpush.msrb.mxu1 %v521_v45  ;;  %740 = vmatpush.msrb.mxu2 %v440_v46 }
  0x78   : > { %748 = vmatpush.msrb.mxu3 %v528_v28 }
  0x79   : > { %551 = vmatpush.msrb.mxu1 %v520_v47 }
  0x7a   : > { %749 = vmatpush.msrb.mxu3 %v527_v30 }
  0x7c   : > { %750 = vmatpush.msrb.mxu3 %v526_v32 }
  0x7e   : > { %751 = vmatpush.msrb.mxu3 %v525_v34 }
  0x80   : > { %752 = vmatpush.msrb.mxu3 %v524_v36 }
  0x82   : > { %753 = vmatpush.msrb.mxu3 %v523_v39 }
  0x84   : > { %754 = vmatpush.msrb.mxu3 %v522_v42 }
  0x86   : > { %755 = vmatpush.msrb.mxu3 %v521_v45 }
  0x88   : > { %756 = vmatpush.msrb.mxu3 %v520_v47 }
  0xd4   : > { %v347_v48 = vpop.f32.mrf.mxu0 }
  0xd5   : > { %v370_v49 = vpop.f32.mrf.mxu1 }
  0xd6   : > { %v371_v50 = vadd.f32 %v370_v49, %v347_v48 }
  0xd9   : > { %v410_v52 = vpop.f32.mrf.mxu2 }
  0xda   : > { %v416_v53 = vadd.f32 %v410_v52, %v371_v50 }
  0xdc   : > { %v420_v55 = vmul.f32 %v838_v51, %v416_v53  ;;  %v350_v56 = vpop.f32.mrf.mxu0 }
  0xdd   : > { %v373_v57 = vpop.f32.mrf.mxu1 }
  0xde   : > { %v374_v58 = vadd.f32 %v373_v57, %v350_v56  ;;  %v424_v59 = vadd.f32 %v839_v54, %v420_v55 }
  0xe0   : > { %v426_v60 = vmax.f32 %v424_v59, 0.0 }
  0xe1   : > { %v413_v61 = vpop.f32.mrf.mxu2 }
  0xe2   : > { %v417_v62 = vadd.f32 %v413_v61, %v374_v58  ;;  %489 = vmatmul.f32.vlgmr.msra.gmra.mxu3 %v426_v60  ;;  %v428_v2 = vrot.slane %v426_v60, 7  ;;  %v434_v5 = vrot.slane %v426_v60, 1 }
  0xe4   : > { %v421_v63 = vmul.f32 %v838_v51, %v417_v62 }
  0xe6   : > { %v425_v0 = vadd.f32 %v839_v54, %v421_v63 }
  0xe8   : > { %v427_v1 = vmax.f32 %v425_v0, 0.0 }
  0xea   : > { %492 = vmatmul.f32.gmra.mxu3 %v427_v1  ;;  %v429_v4 = vrot.slane %v427_v1, 7  ;;  %v435_v6 = vrot.slane %v427_v1, 1 }
  0xec   : > { %v431_v7 = vsel %vm277_vm1, %v429_v4, %v428_v2  ;;  %v430_v8 = vsel %vm277_vm1, %v428_v2, %v429_v4  ;;  %v436_v9 = vsel %vm288_vm0, %v434_v5, %v435_v6  ;;  %v437_v10 = vsel %vm288_vm0, %v435_v6, %v434_v5 }
  0xed   : > { %713 = vmatmul.msk.f32.vlgmr.msrb.gmra.mxu0 %vm723_vm2, %v431_v7  ;;  %515 = vmatmul.f32.vlgmr.msrb.gmra.mxu2 %v430_v8 }
  0xee   : > { %552 = vmatmul.f32.vlgmr.msrb.gmra.mxu1 %v436_v9 }
  0xf2   : > { %715 = vmatmul.msk.f32.vlgmr.msrb.gmra.mxu3 %vm724_vm3, %v437_v10 }
 0x165   : > { %v490_v11 = vpop.f32.mrf.mxu3 }
 0x16a   : > { %v513_v12 = vpop.f32.mrf.mxu0 }
 0x16b   : > { %v514_v13 = vadd.f32 %v513_v12, %v490_v11  ;;  %v553_v15 = vpop.f32.mrf.mxu1 }
 0x16d   : > { %v559_v16 = vadd.f32 %v553_v15, %v514_v13  ;;  %v493_v18 = vpop.f32.mrf.mxu3 }
 0x16f   : > { %v563_v19 = vmul.f32 %v840_v14, %v559_v16 }
 0x170   : > { %v516_v21 = vpop.f32.mrf.mxu2 }
 0x171   : > { %v567_v20 = vadd.f32 %v841_v17, %v563_v19  ;;  %v517_v38 = vadd.f32 %v516_v21, %v493_v18 }
 0x173   : > { %v569_v22 = vadd.f32 %v567_v20, %v1211_v40 }
 0x175   : > { %v571_v23 = vmax.f32 %v569_v22, 0.0  ;;  %v556_v3 = vpop.f32.mrf.mxu3 }
 0x176   : > { %v560_v24 = vadd.f32 %v556_v3, %v517_v38 }
 0x177   : > { %573 = vst [vmem:[%s265_s26] sm:$0xff] %v571_v23 }
 0x178   : > { %v564_v25 = vmul.f32 %v840_v14, %v560_v24 }
 0x17a   : > { %v568_v26 = vadd.f32 %v841_v17, %v564_v25 }
 0x17c   : > { %v570_v40 = vadd.f32 %v568_v26, %v1214_v44 }
 0x17e   : > { %v572_v27 = vmax.f32 %v570_v40, 0.0 }
 0x180   : > { %574 = vst [vmem:[%s265_s26 + $0x8] sm:$0xff] %v572_v27 }
 0x181   : > { %989 = shalt.err (!%p986_p10)
}
 0x182   : > { %s1043_s30 = smov 128   ;;  %s1044_s24 = smov 8  }
 0x183   : > { %771 = dma.vmem_to_hbm [thread:$0]  (%p1158_p3), %s589_s13, 256, %s591_s14, %s576_s19, %s1043_s30, %s1043_s30, %s1044_s24  }
 0x184 PF: > { %s605_s25 = sand.u32 1, %s1024_s15   ;;  %p1301_p12 = scmp.ge.s32.totalorder %s1036_s18, 2 }
 0x185   : > { %s606_s21 = scalar_lea.sflag [#allocation4], %s605_s25 }
 0x186   : > { %p788_p13 = pnand %p1301_p12, %p1105_p6 }
 0x188   : > { %p789_p0 = pneg %p788_p13 }
 0x18a   : > { %1019 = dma.done.wait (%p789_p0), %s606_s21, 256  }
 0x18b   : > { %1021 = vsyncadd (%p789_p0), %s606_s21, 4294967040  ;;  %p19_p5 = scmp.ge.s32.totalorder %s1143_s23, 4   ;;  %s1302_s15 = smov %s1028_s16 }
 0x18c   : > { %s1303_s16 = smov %s1032_s17  ;;  %s1304_s17 = smov %s1154_s27 }
 0x18d   : > { %s1305_s18 = smov %s1143_s23  ;;  %21 = sbr.rel (!%p19_p5) target bundleno = 7 (0x7), region = 97 }
 0x192   :  { %612 = vsyncpa [#allocation3], 1 }
 0x193   :  { %614 = vsyncpa [#allocation3 + $0x1], 1 }
 0x194   :  { %615 = vsyncpa [#allocation6], 1 }
 0x195   :  { %616 = vsyncpa [#allocation9], 1 }
 0x196   :  { %617 = vsyncpa [#allocation4], 1 }
 0x197   :  { %619 = vsyncpa [#allocation4 + $0x1], 1 }

</bundles_post_ra>
